<compile_context>
chip_gen: v5e
topology: v5e:2x2
jax: 0.10.0
libtpu: 0.0.40
codegen_flags: <defaults>
</compile_context>

<pallas_src>
import functools

import jax
import jax.numpy as jnp
from jax.experimental import pallas as pl
from jax.experimental.pallas import tpu as pltpu


# ------------------------------ Pallas kernel ------------------------------

def _gat_attention_kernel(f1_ref, f2_ref, bias_ref, keys_ref, out_ref,
                          *, n_heads, f_out, alpha, apply_elu):
    """Masked multi-head attention core of one GAT layer, for one row block.

    f1_ref  : [TR, H]        query scores  h_i . a1_h   (f32, row-tiled)
    f2_ref  : [H, N]         key scores    h_j . a2_h   (f32, full)
    bias_ref: [TR, N]        additive adjacency mask (0 / -1e12)  (bf16, row-tiled)
    keys_ref: [N, H*F_out]   projected node features, all heads   (bf16, full)
    out_ref : [TR, H*F_out]  lane-dense output slab (heads = column blocks)
    """
    f1 = f1_ref[...]
    f2 = f2_ref[...]
    bias = bias_ref[...].astype(jnp.float32)   # one cast per tile, shared by all heads
    keys = keys_ref[...]                       # already bf16: no per-head casts
    alpha_f = jnp.float32(alpha)

    head_outs = []
    for head in range(n_heads):
        lo = head * f_out
        # e[i, j] = LeakyReLU(h_i.a1 + h_j.a2) + mask : broadcast-add on the VPU,
        # LeakyReLU as max(e, alpha*e) (2 VPU ops), additive mask (1 op).
        e = f1[:, head:head + 1] + f2[head:head + 1, :]            # [TR, N] f32
        e = jnp.maximum(e, alpha_f * e) + bias

        # Row softmax with deferred normalization.  exp runs in bf16 (native EUP
        # on v6e/v7x) and p is already in the matmul dtype; sum accumulates f32.
        m = jnp.max(e, axis=1, keepdims=True)                      # [TR, 1] f32
        p = jnp.exp((e - m).astype(jnp.bfloat16))                  # [TR, N] bf16
        s = jnp.sum(p, axis=1, keepdims=True, dtype=jnp.float32)   # [TR, 1] f32

        # Attention dropout: eval-mode identity.
        hp = jnp.dot(p, keys[:, lo:lo + f_out],
                     preferred_element_type=jnp.float32)           # [TR, F_out] f32
        hp = hp * pl.reciprocal(s, approx=True)

        if apply_elu:
            # ELU; clamp before exp so the discarded branch never produces inf.
            hp = jnp.where(hp > 0, hp, jnp.exp(jnp.minimum(hp, 0.0)) - 1.0)

        head_outs.append(hp)
        # This head's [TR, N] e/p temporaries are dead here (consumed by the dot
        # above); only the small [TR, F_out] partial stays live across heads.

    # One lane-dense store per row tile (no 8-lane masked column stores).
    out_ref[...] = jnp.concatenate(head_outs, axis=1).astype(out_ref.dtype)


def _vmem_limit_bytes():
    # Leave ~1/8 headroom for compiler scratch / double buffers instead of
    # pinning to physical capacity (v7x has only 64 MiB per TensorCore):
    # -> ~112 MiB on v5e/v6e, ~56 MiB on v7x.
    try:
        cap = int(pltpu.get_tpu_info().vmem_capacity_bytes)
    except Exception:
        cap = 64 * 1024 * 1024
    return cap - cap // 8


def gat_attention(f1, f2, bias, keys, *, alpha, apply_elu, row_tile=None):
    """Row-tiled masked attention + aggregation for all heads of one layer."""
    n, hf = keys.shape
    n_heads = f2.shape[0]
    f_out = hf // n_heads

    tr = n if row_tile is None else min(int(row_tile), n)
    assert tr == n or tr % 8 == 0, "row tile must be a multiple of 8"
    grid = (pl.cdiv(n, tr),)

    kernel = functools.partial(_gat_attention_kernel, n_heads=n_heads,
                               f_out=f_out, alpha=float(alpha),
                               apply_elu=apply_elu)

    cost = pl.CostEstimate(
        flops=2 * n * n * hf + 8 * n * n * n_heads,         # p@keys + e-path vector work
        transcendentals=n * n * n_heads + n * hf,           # softmax exp + ELU
        bytes_accessed=(n * n * bias.dtype.itemsize         # adjacency bias stream
                        + n * hf * keys.dtype.itemsize      # keys
                        + n * hf * 4                        # output
                        + 2 * n * n_heads * 4))             # f1 / f2

    return pl.pallas_call(
        kernel,
        out_shape=jax.ShapeDtypeStruct((n, hf), jnp.float32),
        grid=grid,
        in_specs=[
            pl.BlockSpec((tr, n_heads), lambda r: (r, 0)),   # f1, row block
            pl.BlockSpec((n_heads, n), lambda r: (0, 0)),    # f2, all nodes
            pl.BlockSpec((tr, n), lambda r: (r, 0)),         # additive mask, row block
            pl.BlockSpec((n, hf), lambda r: (0, 0)),         # bf16 keys, all heads
        ],
        out_specs=pl.BlockSpec((tr, hf), lambda r: (r, 0)),
        compiler_params=pltpu.CompilerParams(
            dimension_semantics=("parallel",),
            vmem_limit_bytes=_vmem_limit_bytes()),
        cost_estimate=cost,
    )(f1, f2, bias, keys)


# ------------------------------ layer wrapper -------------------------------

def gat_layer(x, bias, w_wide, a_stack, *, alpha, apply_elu, row_tile=None):
    """One GraphAttentionLayer (all heads).  O(N*F) work hoisted to XLA."""
    n = x.shape[0]
    n_heads, _, f_out = a_stack.shape
    # Projection done ONCE per layer (not per row tile / per TensorCore):
    h = jnp.dot(x, w_wide, preferred_element_type=jnp.float32)      # [N, H*F_out]
    h_heads = h.reshape(n, n_heads, f_out)
    # Attention-vector dots are grid-invariant -> hoisted as well.
    f1 = jnp.einsum('nhf,hf->nh', h_heads, a_stack[:, 0, :])        # [N, H]
    f2 = jnp.einsum('hf,nhf->hn', a_stack[:, 1, :], h_heads)        # [H, N]
    keys = h.astype(jnp.bfloat16)   # key-side cast once; halves resident key VMEM
    return gat_attention(f1, f2, bias, keys, alpha=alpha,
                         apply_elu=apply_elu, row_tile=row_tile)


def pack_head_params(head_params, f_out):
    """Stack per-head (W, a) into W_wide [F_in, H*F_out] and a [H, 2, F_out]."""
    w_wide = jnp.concatenate([w for (w, _) in head_params], axis=1)
    a_stack = jnp.stack(
        [jnp.stack([a[:f_out, 0], a[f_out:, 0]], axis=0) for (_, a) in head_params],
        axis=0)
    return w_wide, a_stack


def gat_multi_head_forward(x, adj, params, *, alpha, row_tile=None):
    """GATmulti_head.forward (eval mode: F.dropout = identity)."""
    n_hid = params["heads"][0][0].shape[1]
    w_wide, a_stack = pack_head_params(params["heads"], n_hid)

    # Additive adjacency mask built once (bf16) and shared by BOTH layers:
    # halves the only O(N^2) HBM stream and removes the in-kernel mask select.
    bias = jnp.where(adj > 0, 0.0, -1e12).astype(jnp.bfloat16)

    # x = F.dropout(x) -> identity.  torch.cat(dim=1) over heads is realized by
    # the column-blocked lane-dense output slab of the fused kernel.
    h = gat_layer(x, bias, w_wide, a_stack, alpha=alpha, apply_elu=True,
                  row_tile=row_tile)
    # h = F.dropout(h) -> identity.
    w_o, a_o = params["out"]
    n_class = w_o.shape[1]
    w_wide_o, a_stack_o = pack_head_params([(w_o, a_o)], n_class)
    # out_att has concat=False (raw h'); the subsequent F.elu equals ELU in-kernel.
    return gat_layer(h, bias, w_wide_o, a_stack_o, alpha=alpha,
                     apply_elu=True, row_tile=row_tile)


# ------------------------------ params / ref -------------------------------

def xavier_uniform(key, shape, gain=1.414):
    fan_in, fan_out = shape
    bound = gain * (6.0 / (fan_in + fan_out)) ** 0.5
    return jax.random.uniform(key, shape, jnp.float32, -bound, bound)


def init_params(key, n_feat, n_hid, n_class, n_heads):
    heads = []
    for _ in range(n_heads):
        key, k1, k2 = jax.random.split(key, 3)
        heads.append((xavier_uniform(k1, (n_feat, n_hid)),
                      xavier_uniform(k2, (2 * n_hid, 1))))
    key, k1, k2 = jax.random.split(key, 3)
    out = (xavier_uniform(k1, (n_hid * n_heads, n_class)),
           xavier_uniform(k2, (2 * n_class, 1)))
    return {"heads": heads, "out": out}


def ref_gat_layer(x, adj, w, a, alpha, apply_elu):
    h = x @ w
    fo = w.shape[1]
    f1 = h @ a[:fo]
    f2 = h @ a[fo:]
    e = f1 + f2.T
    e = jnp.where(e > 0, e, alpha * e)
    e = jnp.where(adj > 0, e, -1e12)
    attn = jax.nn.softmax(e, axis=1)
    hp = attn @ h
    return jax.nn.elu(hp) if apply_elu else hp


def ref_forward(x, adj, params, alpha):
    heads = [ref_gat_layer(x, adj, w, a, alpha, True) for (w, a) in params["heads"]]
    h = jnp.concatenate(heads, axis=1)
    w_o, a_o = params["out"]
    return jax.nn.elu(ref_gat_layer(h, adj, w_o, a_o, alpha, False))


# ---------------------------------- main -----------------------------------

if __name__ == "__main__":
    N, n_feat, n_hid, n_class, n_heads = 32, 16, 8, 4, 4
    alpha = 0.2
    row_tile = 16   # 2 row blocks -> exercises the parallel, pipelined grid

    key = jax.random.PRNGKey(0)
    kx, kadj, kp = jax.random.split(key, 3)

    x = jax.random.normal(kx, (N, n_feat), jnp.float32)
    adj = (jax.random.uniform(kadj, (N, N)) > 0.6).astype(jnp.float32)
    adj = jnp.maximum(adj, jnp.eye(N, dtype=jnp.float32))  # self loops

    params = init_params(kp, n_feat, n_hid, n_class, n_heads)

    out = gat_multi_head_forward(x, adj, params, alpha=alpha, row_tile=row_tile)
    out = jax.block_until_ready(out)

    ref = ref_forward(x, adj, params, alpha)
    assert out.shape == (N, n_class)
    # bf16 softmax / keys and approx reciprocal => slightly loose tolerance.
    assert jnp.allclose(out, ref, atol=2e-2, rtol=2e-2), "mismatch vs JAX reference"

    print("KERNEL_OK")
</pallas_src>

<mosaic_0001>
module attributes {stable_mosaic.version = 11 : i64} {
  func.func @_gat_attention_kernel(%arg0: i32, %arg1: memref<16x4xf32, #tpu.memory_space<vmem>>, %arg2: memref<4x32xf32, #tpu.memory_space<vmem>>, %arg3: memref<16x32xbf16, #tpu.memory_space<vmem>>, %arg4: memref<32x32xbf16, #tpu.memory_space<vmem>>, %arg5: memref<16x32xf32, #tpu.memory_space<vmem>>) attributes {dimension_semantics = [#tpu.dimension_semantics<parallel>], iteration_bounds = array<i64: 2>, scalar_prefetch = 0 : i64, scratch_operands = 0 : i64, tpu.core_type = #tpu.core_type<tc>, window_params = [{transform_indices = @transform_0, window_bounds = array<i64: 16, 4>}, {pipeline_mode = #tpu.pipeline_mode<synchronous>, transform_indices = @transform_1, window_bounds = array<i64: 4, 32>}, {transform_indices = @transform_2, window_bounds = array<i64: 16, 32>}, {pipeline_mode = #tpu.pipeline_mode<synchronous>, transform_indices = @transform_3, window_bounds = array<i64: 32, 32>}, {transform_indices = @transform_4, window_bounds = array<i64: 16, 32>}]} {
    %c0 = arith.constant 0 : index
    %c0_0 = arith.constant 0 : index
    %0 = vector.load %arg1[%c0, %c0_0] : memref<16x4xf32, #tpu.memory_space<vmem>>, vector<16x4xf32>
    %c0_1 = arith.constant 0 : index
    %c0_2 = arith.constant 0 : index
    %1 = vector.load %arg2[%c0_1, %c0_2] : memref<4x32xf32, #tpu.memory_space<vmem>>, vector<4x32xf32>
    %c0_3 = arith.constant 0 : index
    %c0_4 = arith.constant 0 : index
    %2 = vector.load %arg3[%c0_3, %c0_4] : memref<16x32xbf16, #tpu.memory_space<vmem>>, vector<16x32xbf16>
    %3 = arith.extf %2 : vector<16x32xbf16> to vector<16x32xf32>
    %c0_5 = arith.constant 0 : index
    %c0_6 = arith.constant 0 : index
    %4 = vector.load %arg4[%c0_5, %c0_6] : memref<32x32xbf16, #tpu.memory_space<vmem>>, vector<32x32xbf16>
    %5 = vector.extract_strided_slice %0 {offsets = [0, 0], sizes = [16, 1], strides = [1, 1]} : vector<16x4xf32> to vector<16x1xf32>
    %6 = vector.extract_strided_slice %1 {offsets = [0, 0], sizes = [1, 32], strides = [1, 1]} : vector<4x32xf32> to vector<1x32xf32>
    %7 = vector.broadcast %5 : vector<16x1xf32> to vector<16x32xf32>
    %8 = vector.broadcast %6 : vector<1x32xf32> to vector<16x32xf32>
    %9 = arith.addf %7, %8 : vector<16x32xf32>
    %cst = arith.constant 2.000000e-01 : f32
    %10 = vector.broadcast %cst : f32 to vector<16x32xf32>
    %11 = arith.mulf %10, %9 : vector<16x32xf32>
    %12 = arith.maximumf %9, %11 : vector<16x32xf32>
    %13 = arith.addf %12, %3 : vector<16x32xf32>
    %cst_7 = arith.constant dense<0xFF800000> : vector<16xf32>
    %14 = vector.multi_reduction <maximumf>, %13, %cst_7 [1] : vector<16x32xf32> to vector<16xf32>
    %15 = vector.shape_cast %14 : vector<16xf32> to vector<16x1xf32>
    %16 = vector.broadcast %15 : vector<16x1xf32> to vector<16x32xf32>
    %17 = arith.subf %13, %16 : vector<16x32xf32>
    %18 = arith.truncf %17 : vector<16x32xf32> to vector<16x32xbf16>
    %19 = math.exp %18 : vector<16x32xbf16>
    %20 = arith.extf %19 : vector<16x32xbf16> to vector<16x32xf32>
    %cst_8 = arith.constant dense<0.000000e+00> : vector<16xf32>
    %21 = vector.multi_reduction <add>, %20, %cst_8 [1] : vector<16x32xf32> to vector<16xf32>
    %22 = vector.shape_cast %21 : vector<16xf32> to vector<16x1xf32>
    %23 = vector.extract_strided_slice %4 {offsets = [0, 0], sizes = [32, 8], strides = [1, 1]} : vector<32x32xbf16> to vector<32x8xbf16>
    %cst_9 = arith.constant dense<0.000000e+00> : vector<16x8xf32>
    %24 = tpu.matmul %19, %23, %cst_9 {dimension_numbers = #tpu.dot_dimension_numbers<[1], [0], [0], [1], [0, 0, 1, 1], [], []>} : vector<16x32xbf16>, vector<32x8xbf16>, vector<16x8xf32> -> vector<16x8xf32>
    %25 = tpu.reciprocal %22 {approx = true} : vector<16x1xf32> -> vector<16x1xf32>
    %26 = vector.broadcast %25 : vector<16x1xf32> to vector<16x8xf32>
    %27 = arith.mulf %24, %26 : vector<16x8xf32>
    %cst_10 = arith.constant 0.000000e+00 : f32
    %28 = vector.broadcast %cst_10 : f32 to vector<16x8xf32>
    %29 = arith.cmpf ogt, %27, %28 : vector<16x8xf32>
    %cst_11 = arith.constant 0.000000e+00 : f32
    %30 = vector.broadcast %cst_11 : f32 to vector<16x8xf32>
    %31 = arith.minimumf %27, %30 : vector<16x8xf32>
    %32 = math.exp %31 : vector<16x8xf32>
    %cst_12 = arith.constant 1.000000e+00 : f32
    %33 = vector.broadcast %cst_12 : f32 to vector<16x8xf32>
    %34 = arith.subf %32, %33 : vector<16x8xf32>
    %35 = arith.select %29, %27, %34 : vector<16x8xi1>, vector<16x8xf32>
    %36 = vector.extract_strided_slice %0 {offsets = [0, 1], sizes = [16, 1], strides = [1, 1]} : vector<16x4xf32> to vector<16x1xf32>
    %37 = vector.extract_strided_slice %1 {offsets = [1, 0], sizes = [1, 32], strides = [1, 1]} : vector<4x32xf32> to vector<1x32xf32>
    %38 = vector.broadcast %36 : vector<16x1xf32> to vector<16x32xf32>
    %39 = vector.broadcast %37 : vector<1x32xf32> to vector<16x32xf32>
    %40 = arith.addf %38, %39 : vector<16x32xf32>
    %cst_13 = arith.constant 2.000000e-01 : f32
    %41 = vector.broadcast %cst_13 : f32 to vector<16x32xf32>
    %42 = arith.mulf %41, %40 : vector<16x32xf32>
    %43 = arith.maximumf %40, %42 : vector<16x32xf32>
    %44 = arith.addf %43, %3 : vector<16x32xf32>
    %cst_14 = arith.constant dense<0xFF800000> : vector<16xf32>
    %45 = vector.multi_reduction <maximumf>, %44, %cst_14 [1] : vector<16x32xf32> to vector<16xf32>
    %46 = vector.shape_cast %45 : vector<16xf32> to vector<16x1xf32>
    %47 = vector.broadcast %46 : vector<16x1xf32> to vector<16x32xf32>
    %48 = arith.subf %44, %47 : vector<16x32xf32>
    %49 = arith.truncf %48 : vector<16x32xf32> to vector<16x32xbf16>
    %50 = math.exp %49 : vector<16x32xbf16>
    %51 = arith.extf %50 : vector<16x32xbf16> to vector<16x32xf32>
    %cst_15 = arith.constant dense<0.000000e+00> : vector<16xf32>
    %52 = vector.multi_reduction <add>, %51, %cst_15 [1] : vector<16x32xf32> to vector<16xf32>
    %53 = vector.shape_cast %52 : vector<16xf32> to vector<16x1xf32>
    %54 = vector.extract_strided_slice %4 {offsets = [0, 8], sizes = [32, 8], strides = [1, 1]} : vector<32x32xbf16> to vector<32x8xbf16>
    %cst_16 = arith.constant dense<0.000000e+00> : vector<16x8xf32>
    %55 = tpu.matmul %50, %54, %cst_16 {dimension_numbers = #tpu.dot_dimension_numbers<[1], [0], [0], [1], [0, 0, 1, 1], [], []>} : vector<16x32xbf16>, vector<32x8xbf16>, vector<16x8xf32> -> vector<16x8xf32>
    %56 = tpu.reciprocal %53 {approx = true} : vector<16x1xf32> -> vector<16x1xf32>
    %57 = vector.broadcast %56 : vector<16x1xf32> to vector<16x8xf32>
    %58 = arith.mulf %55, %57 : vector<16x8xf32>
    %cst_17 = arith.constant 0.000000e+00 : f32
    %59 = vector.broadcast %cst_17 : f32 to vector<16x8xf32>
    %60 = arith.cmpf ogt, %58, %59 : vector<16x8xf32>
    %cst_18 = arith.constant 0.000000e+00 : f32
    %61 = vector.broadcast %cst_18 : f32 to vector<16x8xf32>
    %62 = arith.minimumf %58, %61 : vector<16x8xf32>
    %63 = math.exp %62 : vector<16x8xf32>
    %cst_19 = arith.constant 1.000000e+00 : f32
    %64 = vector.broadcast %cst_19 : f32 to vector<16x8xf32>
    %65 = arith.subf %63, %64 : vector<16x8xf32>
    %66 = arith.select %60, %58, %65 : vector<16x8xi1>, vector<16x8xf32>
    %67 = vector.extract_strided_slice %0 {offsets = [0, 2], sizes = [16, 1], strides = [1, 1]} : vector<16x4xf32> to vector<16x1xf32>
    %68 = vector.extract_strided_slice %1 {offsets = [2, 0], sizes = [1, 32], strides = [1, 1]} : vector<4x32xf32> to vector<1x32xf32>
    %69 = vector.broadcast %67 : vector<16x1xf32> to vector<16x32xf32>
    %70 = vector.broadcast %68 : vector<1x32xf32> to vector<16x32xf32>
    %71 = arith.addf %69, %70 : vector<16x32xf32>
    %cst_20 = arith.constant 2.000000e-01 : f32
    %72 = vector.broadcast %cst_20 : f32 to vector<16x32xf32>
    %73 = arith.mulf %72, %71 : vector<16x32xf32>
    %74 = arith.maximumf %71, %73 : vector<16x32xf32>
    %75 = arith.addf %74, %3 : vector<16x32xf32>
    %cst_21 = arith.constant dense<0xFF800000> : vector<16xf32>
    %76 = vector.multi_reduction <maximumf>, %75, %cst_21 [1] : vector<16x32xf32> to vector<16xf32>
    %77 = vector.shape_cast %76 : vector<16xf32> to vector<16x1xf32>
    %78 = vector.broadcast %77 : vector<16x1xf32> to vector<16x32xf32>
    %79 = arith.subf %75, %78 : vector<16x32xf32>
    %80 = arith.truncf %79 : vector<16x32xf32> to vector<16x32xbf16>
    %81 = math.exp %80 : vector<16x32xbf16>
    %82 = arith.extf %81 : vector<16x32xbf16> to vector<16x32xf32>
    %cst_22 = arith.constant dense<0.000000e+00> : vector<16xf32>
    %83 = vector.multi_reduction <add>, %82, %cst_22 [1] : vector<16x32xf32> to vector<16xf32>
    %84 = vector.shape_cast %83 : vector<16xf32> to vector<16x1xf32>
    %85 = vector.extract_strided_slice %4 {offsets = [0, 16], sizes = [32, 8], strides = [1, 1]} : vector<32x32xbf16> to vector<32x8xbf16>
    %cst_23 = arith.constant dense<0.000000e+00> : vector<16x8xf32>
    %86 = tpu.matmul %81, %85, %cst_23 {dimension_numbers = #tpu.dot_dimension_numbers<[1], [0], [0], [1], [0, 0, 1, 1], [], []>} : vector<16x32xbf16>, vector<32x8xbf16>, vector<16x8xf32> -> vector<16x8xf32>
    %87 = tpu.reciprocal %84 {approx = true} : vector<16x1xf32> -> vector<16x1xf32>
    %88 = vector.broadcast %87 : vector<16x1xf32> to vector<16x8xf32>
    %89 = arith.mulf %86, %88 : vector<16x8xf32>
    %cst_24 = arith.constant 0.000000e+00 : f32
    %90 = vector.broadcast %cst_24 : f32 to vector<16x8xf32>
    %91 = arith.cmpf ogt, %89, %90 : vector<16x8xf32>
    %cst_25 = arith.constant 0.000000e+00 : f32
    %92 = vector.broadcast %cst_25 : f32 to vector<16x8xf32>
    %93 = arith.minimumf %89, %92 : vector<16x8xf32>
    %94 = math.exp %93 : vector<16x8xf32>
    %cst_26 = arith.constant 1.000000e+00 : f32
    %95 = vector.broadcast %cst_26 : f32 to vector<16x8xf32>
    %96 = arith.subf %94, %95 : vector<16x8xf32>
    %97 = arith.select %91, %89, %96 : vector<16x8xi1>, vector<16x8xf32>
    %98 = vector.extract_strided_slice %0 {offsets = [0, 3], sizes = [16, 1], strides = [1, 1]} : vector<16x4xf32> to vector<16x1xf32>
    %99 = vector.extract_strided_slice %1 {offsets = [3, 0], sizes = [1, 32], strides = [1, 1]} : vector<4x32xf32> to vector<1x32xf32>
    %100 = vector.broadcast %98 : vector<16x1xf32> to vector<16x32xf32>
    %101 = vector.broadcast %99 : vector<1x32xf32> to vector<16x32xf32>
    %102 = arith.addf %100, %101 : vector<16x32xf32>
    %cst_27 = arith.constant 2.000000e-01 : f32
    %103 = vector.broadcast %cst_27 : f32 to vector<16x32xf32>
    %104 = arith.mulf %103, %102 : vector<16x32xf32>
    %105 = arith.maximumf %102, %104 : vector<16x32xf32>
    %106 = arith.addf %105, %3 : vector<16x32xf32>
    %cst_28 = arith.constant dense<0xFF800000> : vector<16xf32>
    %107 = vector.multi_reduction <maximumf>, %106, %cst_28 [1] : vector<16x32xf32> to vector<16xf32>
    %108 = vector.shape_cast %107 : vector<16xf32> to vector<16x1xf32>
    %109 = vector.broadcast %108 : vector<16x1xf32> to vector<16x32xf32>
    %110 = arith.subf %106, %109 : vector<16x32xf32>
    %111 = arith.truncf %110 : vector<16x32xf32> to vector<16x32xbf16>
    %112 = math.exp %111 : vector<16x32xbf16>
    %113 = arith.extf %112 : vector<16x32xbf16> to vector<16x32xf32>
    %cst_29 = arith.constant dense<0.000000e+00> : vector<16xf32>
    %114 = vector.multi_reduction <add>, %113, %cst_29 [1] : vector<16x32xf32> to vector<16xf32>
    %115 = vector.shape_cast %114 : vector<16xf32> to vector<16x1xf32>
    %116 = vector.extract_strided_slice %4 {offsets = [0, 24], sizes = [32, 8], strides = [1, 1]} : vector<32x32xbf16> to vector<32x8xbf16>
    %cst_30 = arith.constant dense<0.000000e+00> : vector<16x8xf32>
    %117 = tpu.matmul %112, %116, %cst_30 {dimension_numbers = #tpu.dot_dimension_numbers<[1], [0], [0], [1], [0, 0, 1, 1], [], []>} : vector<16x32xbf16>, vector<32x8xbf16>, vector<16x8xf32> -> vector<16x8xf32>
    %118 = tpu.reciprocal %115 {approx = true} : vector<16x1xf32> -> vector<16x1xf32>
    %119 = vector.broadcast %118 : vector<16x1xf32> to vector<16x8xf32>
    %120 = arith.mulf %117, %119 : vector<16x8xf32>
    %cst_31 = arith.constant 0.000000e+00 : f32
    %121 = vector.broadcast %cst_31 : f32 to vector<16x8xf32>
    %122 = arith.cmpf ogt, %120, %121 : vector<16x8xf32>
    %cst_32 = arith.constant 0.000000e+00 : f32
    %123 = vector.broadcast %cst_32 : f32 to vector<16x8xf32>
    %124 = arith.minimumf %120, %123 : vector<16x8xf32>
    %125 = math.exp %124 : vector<16x8xf32>
    %cst_33 = arith.constant 1.000000e+00 : f32
    %126 = vector.broadcast %cst_33 : f32 to vector<16x8xf32>
    %127 = arith.subf %125, %126 : vector<16x8xf32>
    %128 = arith.select %122, %120, %127 : vector<16x8xi1>, vector<16x8xf32>
    %129 = tpu.concatenate %35, %66, %97, %128 in 1 : vector<16x8xf32>, vector<16x8xf32>, vector<16x8xf32>, vector<16x8xf32> -> vector<16x32xf32>
    %c0_34 = arith.constant 0 : index
    %c0_35 = arith.constant 0 : index
    %130 = vector.load %arg5[%c0_34, %c0_35] : memref<16x32xf32, #tpu.memory_space<vmem>>, vector<16x32xf32>
    tpu.vector_store %arg5[%c0_34, %c0_35], %129 {strides = array<i32>} : memref<16x32xf32, #tpu.memory_space<vmem>>, vector<16x32xf32>,
    return
  }
  func.func @transform_0(%arg0: i32) -> (i32, i32) {
    %c0_i32 = arith.constant 0 : i32
    %c0_i32_0 = arith.constant 0 : i32
    return %arg0, %c0_i32 : i32, i32
  }
  func.func @transform_1(%arg0: i32) -> (i32, i32) {
    %c0_i32 = arith.constant 0 : i32
    %c0_i32_0 = arith.constant 0 : i32
    %c0_i32_1 = arith.constant 0 : i32
    return %c0_i32, %c0_i32_0 : i32, i32
  }
  func.func @transform_2(%arg0: i32) -> (i32, i32) {
    %c0_i32 = arith.constant 0 : i32
    %c0_i32_0 = arith.constant 0 : i32
    return %arg0, %c0_i32 : i32, i32
  }
  func.func @transform_3(%arg0: i32) -> (i32, i32) {
    %c0_i32 = arith.constant 0 : i32
    %c0_i32_0 = arith.constant 0 : i32
    %c0_i32_1 = arith.constant 0 : i32
    return %c0_i32, %c0_i32_0 : i32, i32
  }
  func.func @transform_4(%arg0: i32) -> (i32, i32) {
    %c0_i32 = arith.constant 0 : i32
    %c0_i32_0 = arith.constant 0 : i32
    return %arg0, %c0_i32 : i32, i32
  }
}

</mosaic_0001>

<bundles_post_ra>
// kernel: tpu_custom_call.1
= control target key start
LH: loop header
LB: loop body
LE: loop exit
PB: predicated region body
PF: predicated region fallthrough
CT: control target
= control target key end

     0   :  { %9 = vsyncpa [#allocation3], 0  ;;  %s1101_s0 = inlined_call_operand.vmem [shape: f32[32,4], index: 0, kind: input, shape index: {}]   ;;  %s1102_s1 = inlined_call_operand.vmem [shape: f32[4,32], index: 1, kind: input, shape index: {}]   ;;  %s1103_s2 = inlined_call_operand.vmem [shape: bf16[32,32], index: 2, kind: input, shape index: {}]   ;;  %s1104_s3 = inlined_call_operand.vmem [shape: bf16[32,32], index: 3, kind: input, shape index: {}]   ;;  %s1105_s4 = inlined_call_operand.hbm [shape: f32[32,32], index: 4, kind: output, shape index: {}]  }
   0x1   :  { %11 = vsyncpa [#allocation3 + $0x1], 0  ;;  %s932_s15 = smov 0   ;;  %s934_s16 = smov 0  }
   0x2   :  { %s936_s17 = smov 0   ;;  %s938_s18 = smov 0  }
   0x3 LB: > { %s953_s19 = sadd.s32 4294967295, %s894_s18   ;;  %s687_s20 = sadd.s32 4294967294, %s894_s18   ;;  %s894_s18 = sphi %s938_s18, %s1111_s18   ;;  %s890_s17 = sphi %s936_s17, %s1110_s17   ;;  %s886_s16 = sphi %s934_s16, %s1109_s16   ;;  %s882_s15 = sphi %s932_s15, %s1108_s15  }
   0x4   : > { %s957_s21 = sadd.s32 1, %s894_s18   ;;  %s118_s22 = sadd.s32 1, %s890_s17 }
   0x5   : > { %s115_s23 = ssub.s32 %s894_s18, %s957_s21  ;;  %p128_p0 = scmp.ne.s32.totalorder %s890_s17, %s886_s16 }
   0x6   : > { %p116_p1 = scmp.eq.s32.totalorder %s115_s23, 0  ;;  %p129_p2 = scmp.eq.s32.totalorder %s953_s19, 1 }
   0x7   : > { %p134_p3 = scmp.ne.s32.totalorder %s886_s16, %s882_s15  ;;  %p135_p4 = scmp.eq.s32.totalorder %s687_s20, 1 }
   0x8   : > { %s968_s24 = scalar_select %p116_p1, %s890_s17, %s118_s22  }
   0x9   : > { %p970_p5 = por %p129_p2, %p128_p0  ;;  %p974_p6 = por %p135_p4, %p134_p3 }
   0xa   : > { %p690_p7 = scmp.ge.s32.totalorder %s894_s18, 1  ;;  %p177_p8 = scmp.lt.s32.totalorder %s894_s18, 3 }
   0xc   : > { %p178_p9 = pnand %p690_p7, %p177_p8 }
   0xd   : > { %s692_s27 = sshll.u32 (!%p178_p9), %s953_s19, 1  ;;  %s900_s10 = smov (!%p178_p9), 112  }
   0xe   : > { %181 = sbr.rel (%p178_p9) target bundleno = 584 (0x248), region = 36  ;;  %p209_p10 = scmp.lt.s32.totalorder (!%p178_p9), %s692_s27, 3 }
   0xf   : > { %s901_s11 = smov (!%p178_p9), 104   ;;  %s903_s28 = smov (!%p178_p9), 16  }
  0x10   : > { %s904_s29 = smov (!%p178_p9), 8   ;;  %s905_s30 = smov (!%p178_p9), 24  }
  0x11   : > { %s205_s5 = sand.u32 (!%p178_p9), 1, %s886_s16   ;;  %s723_s8 = sshll.u32 (!%p178_p9), %s953_s19, 4 }
  0x12   : > { %s598_s19 = scalar_lea.sflag (!%p178_p9), [#allocation3], %s205_s5 }
  0x13   : > { %v984_v0 = vld [vmem:[%s1104_s3 + $0x8] sm:$0xff]  ;;  %v896_v1 = vmov 3   ;;  %v897_v2 = vmov 2   ;;  %v898_v3 = vmov 1   ;;  %s1113_s27 = smov (!%p209_p10, %s692_s27), 3  ;;  %v990_v4 = vld [vmem:[%s1104_s3] sm:$0xff] }
  0x14   : > { %779 = vset.pattern.permute.xlu1 %v896_v1  ;;  %778 = vset.pattern.permute.xlu0 %v897_v2  ;;  %s693_s6 = sshll.u32 %s1113_s27, 3  ;;  %v899_v7 = vmov 0   ;;  %s695_s12 = sshll.u32 %s1113_s27, 2  ;;  %v1003_v8 = vld [vmem:[%s1102_s1] sm:$0xf]  ;;  %vm252_vm0 = vcmask 261120  }
  0x15   : > { %780 = vset.pattern.permute.xlu2 %v898_v3  ;;  %298 = vmatpush.bf16.msra.mxu0 %v984_v0  ;;  %s212_s9 = scalar_lea.vmem %s1101_s0, %s693_s6  ;;  %s218_s23 = scalar_lea.vmem %s1103_s2, %s695_s12  ;;  %v490_v10 = vperm.slane %v1003_v8, 3  ;;  %v410_v11 = vperm.slane %v1003_v8, 2  ;;  %v330_v20 = vperm.slane %v1003_v8, 1  ;;  %v243_v54 = vperm.slane %v1003_v8, 0 }
  0x16   : > { %v222_v5 = vld [vmem:[%s212_s9] sm:$0xff]  ;;  %v223_v6 = vld [vmem:[%s212_s9 + $0x8] sm:$0xff]  ;;  %s902_s27 = smov 120   ;;  %vm586_vm7 = vcmask 64512   ;;  %s691_s6 = sshll.u32 %s205_s5, 4  ;;  %vm589_vm9 = vcmask 130048  }
  0x17   : > { %483 = vperm.xlu1 %779, %v222_v5   ;;  %403 = vperm.xlu0 %778, %v222_v5   ;;  %v725_v12 = vld [vmem:[%s218_s23] sm:$0xff]   ;;  %vm592_vm10 = vcmask 195584   ;;  %s207_s7 = scalar_lea.vmem [#allocation2], %s691_s6 }
  0x18   : > { %323 = vperm.xlu2 %780, %v222_v5   ;;  %v726_v17 = vunpack.c.l.bf16 %v725_v12  ;;  %v727_v36 = vunpack.c.h.bf16 %v725_v12  ;;  %s610_s12 = sshll.u32 %s207_s7, 4  ;;  %s611_s12 = int_to_ptr.vmem [resolvable:$true] %s610_s12 }
  0x19   : > { %299 = vmatpush.bf16.msra.mxu0 %v990_v4 }
  0x1f   : > { %487 = vperm.xlu1 %779, %v223_v6   ;;  %407 = vperm.xlu0 %778, %v223_v6  }
  0x20   : > { %327 = vperm.xlu2 %780, %v223_v6  }
  0x27   : > { %781 = vset.pattern.permute.xlu0 %v899_v7  ;;  %782 = vset.pattern.permute.xlu1 %v899_v7 }
  0x28   : > { %235 = vperm.xlu0 %781, %v222_v5   ;;  %240 = vperm.xlu1 %782, %v223_v6  }
  0x29   : > { %445 = vrot.lane.b32.xlu2 %v984_v0, %s900_s10 }
  0x30   : > { %525 = vrot.lane.b32.xlu0 %v984_v0, %s901_s11  ;;  %443 = vrot.lane.b32.xlu1 %v990_v4, %s900_s10 }
  0x31   : > { %783 = vset.pattern.permute.xlu0 %v896_v1 }
  0x72   : > { %v324_v9 = vpop.permute.xlu2 %323 }
  0x73   : > { %v331_v26 = vadd.f32 %v330_v20, %v324_v9 }
  0x75   : > { %v333_v37 = vmul.f32 0.2, %v331_v26 }
  0x77   : > { %v335_v43 = vmax.f32 %v331_v26, %v333_v37 }
  0x79   : > { %v337_v48 = vadd.f32 %v726_v17, %v335_v43 }
  0x7a   : > { %v328_v23 = vpop.permute.xlu2 %327 }
  0x7b   : > { %v332_v27 = vadd.f32 %v330_v20, %v328_v23  ;;  %v339_v50 = vsel %vm252_vm0, %v337_v48, -inf }
  0x7d   : > { %v334_v38 = vmul.f32 0.2, %v332_v27 }
  0x7f   : > { %v336_v44 = vmax.f32 %v332_v27, %v334_v38 }
  0x81   : > { %v338_v49 = vadd.f32 %v727_v36, %v336_v44 }
  0x83   : > { %v446_v47 = vpop.permute.xlu2 %445  ;;  %v342_v51 = vsel %vm252_vm0, %v338_v49, -inf }
  0x84   : > { %458 = vmatpush.bf16.msra.mxu2 %v446_v47 }
  0x89   : > { %v484_v13 = vpop.permute.xlu1 %483  ;;  %v404_v14 = vpop.permute.xlu0 %403 }
  0x8a   : > { %v491_v15 = vadd.f32 %v490_v10, %v484_v13  ;;  %v411_v16 = vadd.f32 %v410_v11, %v404_v14 }
  0x8c   : > { %v493_v18 = vmul.f32 0.2, %v491_v15  ;;  %v413_v19 = vmul.f32 0.2, %v411_v16 }
  0x8e   : > { %v495_v21 = vmax.f32 %v491_v15, %v493_v18  ;;  %v415_v22 = vmax.f32 %v411_v16, %v413_v19 }
  0x90   : > { %v1011_v24 = vadd.f32 %v726_v17, %v495_v21  ;;  %v1013_v25 = vadd.f32 %v726_v17, %v415_v22 }
  0x91   : > { %v488_v28 = vpop.permute.xlu1 %487  ;;  %v408_v29 = vpop.permute.xlu0 %407 }
  0x92   : > { %v492_v30 = vadd.f32 %v490_v10, %v488_v28  ;;  %v412_v31 = vadd.f32 %v410_v11, %v408_v29  ;;  %v499_v32 = vsel %vm252_vm0, %v1011_v24, -inf  ;;  %v419_v33 = vsel %vm252_vm0, %v1013_v25, -inf }
  0x93   : > { %500 = vmax.xlane.f32.xlu0 %v499_v32  ;;  %420 = vmax.xlane.f32.xlu2 %v419_v33 }
  0x94   : > { %v494_v34 = vmul.f32 0.2, %v492_v30  ;;  %v414_v35 = vmul.f32 0.2, %v412_v31 }
  0x96   : > { %v496_v39 = vmax.f32 %v492_v30, %v494_v34  ;;  %v416_v40 = vmax.f32 %v412_v31, %v414_v35 }
  0x98   : > { %v498_v41 = vadd.f32 %v727_v36, %v496_v39  ;;  %v418_v42 = vadd.f32 %v727_v36, %v416_v40 }
  0x9a   : > { %v502_v45 = vsel %vm252_vm0, %v498_v41, -inf  ;;  %v422_v46 = vsel %vm252_vm0, %v418_v42, -inf  ;;  %v241_v52 = vpop.permute.xlu1 %240  ;;  %v236_v55 = vpop.permute.xlu0 %235 }
  0x9b   : > { %503 = vmax.xlane.f32.xlu2 %v502_v45  ;;  %423 = vmax.xlane.f32.xlu1 %v422_v46  ;;  %v244_v56 = vadd.f32 %v243_v54, %v236_v55  ;;  %v245_v62 = vadd.f32 %v243_v54, %v241_v52 }
  0x9d   : > { %v246_v57 = vmul.f32 0.2, %v244_v56  ;;  %v247_v63 = vmul.f32 0.2, %v245_v62 }
  0x9f   : > { %v248_v59 = vmax.f32 %v244_v56, %v246_v57 }
  0xa1   : > { %v1028_v60 = vadd.f32 %v726_v17, %v248_v59 }
  0xa2   : > { %v444_v53 = vpop.permute.xlu1 %443  ;;  %v526_v58 = vpop.permute.xlu0 %525 }
  0xa3   : > { %340 = vmax.xlane.f32.xlu2 %v339_v50  ;;  %343 = vmax.xlane.f32.xlu1 %v342_v51  ;;  %v253_v61 = vsel %vm252_vm0, %v1028_v60, -inf }
  0xa4   : > { %459 = vmatpush.bf16.msra.mxu2 %v444_v53  ;;  %538 = vmatpush.bf16.msra.mxu3 %v526_v58 }
  0xa7   : > { %365 = vrot.lane.b32.xlu0 %v984_v0, %s902_s27  ;;  %v249_v0 = vmax.f32 %v245_v62, %v247_v63 }
  0xa9   : > { %v1032_v1 = vadd.f32 %v727_v36, %v249_v0 }
  0xab   : > { %v256_v2 = vsel %vm252_vm0, %v1032_v1, -inf }
  0xbb   : > { %523 = vrot.lane.b32.xlu2 %v990_v4, %s901_s11  ;;  %s609_s11 = scalar_lea.hbm %s1105_s4, %s723_s8 }
  0xbc   : > { %363 = vrot.lane.b32.xlu1 %v990_v4, %s902_s27  ;;  %s612_s13 = sshll.u32 %s609_s11, 4  ;;  %s852_s27 = scalar_lea.hbm %s1105_s4, 32  ;;  %s613_s13 = int_to_ptr.hbm [resolvable:$true] %s612_s13 }
  0xbd   : > { %s846_s14 = sshra.s32 %s613_s13, 4  ;;  %s847_s14 = int_to_ptr.hbm [resolvable:$true] %s846_s14 }
  0xbe   : > { %s848_s20 = scalar_lea.hbm %s847_s14, 16  ;;  %p853_p0 = scmp.lt.s32.totalorder %s847_s14, %s1105_s4 }
  0xbf   : > { %p849_p11 = scmp.ne.s32.totalorder %s847_s14, %s848_s20  ;;  %p854_p1 = scmp.lt.s32.totalorder %s852_s27, %s848_s20 }
  0xc1   : > { %p850_p12 = pnand %p849_p11, %p970_p5  ;;  %p855_p2 = por %p854_p1, %p853_p0 }
  0xc3   : > { %p851_p13 = pneg %p850_p12 }
  0xc5   : > { %p856_p3 = pnand %p855_p2, %p851_p13 }
  0xd1   : > { %254 = vmax.xlane.f32.xlu0 %v253_v61 }
  0xe4   : > { %257 = vmax.xlane.f32.xlu2 %v256_v2 }
 0x106   : > { %v421_v3 = vpop.xlane.xlu2 %420  ;;  %v501_v4 = vpop.xlane.xlu0 %500 }
 0x107   : > { %v425_v7 = vsub.f32 %v1013_v25, %v421_v3  ;;  %v505_v8 = vsub.f32 %v1011_v24, %v501_v4 }
 0x10e   : > { %v504_v5 = vpop.xlane.xlu2 %503  ;;  %v424_v6 = vpop.xlane.xlu1 %423 }
 0x10f   : > { %v506_v9 = vsub.f32 %v498_v41, %v504_v5  ;;  %v426_v10 = vsub.f32 %v418_v42, %v424_v6 }
 0x111   : > { %v507_v11 = vpack.c.bf16 %v506_v9, %v505_v8  ;;  %v427_v12 = vpack.c.bf16 %v426_v10, %v425_v7 }
 0x113   : > { %v508_v13 = vunpack.c.l.bf16 %v507_v11  ;;  %v509_v14 = vunpack.c.h.bf16 %v507_v11  ;;  %v428_v15 = vunpack.c.l.bf16 %v427_v12  ;;  %v429_v16 = vunpack.c.h.bf16 %v427_v12 }
 0x115   : > { %v510_v17 = vmul.f32 1.442695, %v508_v13  ;;  %v512_v18 = vmul.f32 1.442695, %v509_v14  ;;  %v430_v19 = vmul.f32 1.442695, %v428_v15 }
 0x116   : > { %v432_v20 = vmul.f32 1.442695, %v429_v16  ;;  %v341_v21 = vpop.xlane.xlu2 %340  ;;  %v344_v22 = vpop.xlane.xlu1 %343 }
 0x117   : > { %784 = vpow2.f32 %v510_v17  ;;  %v345_v23 = vsub.f32 %v337_v48, %v341_v21  ;;  %v346_v26 = vsub.f32 %v338_v49, %v344_v22 }
 0x118   : > { %786 = vpow2.f32 %v512_v18 }
 0x119   : > { %788 = vpow2.f32 %v430_v19  ;;  %v347_v24 = vpack.c.bf16 %v346_v26, %v345_v23  ;;  %v366_v25 = vpop.permute.xlu0 %365 }
 0x11a   : > { %790 = vpow2.f32 %v432_v20  ;;  %378 = vmatpush.bf16.msra.mxu1 %v366_v25 }
 0x11b   : > { %v348_v27 = vunpack.c.l.bf16 %v347_v24  ;;  %v349_v28 = vunpack.c.h.bf16 %v347_v24 }
 0x11d   : > { %v785_v29 = vpop.eup %784  ;;  %v350_v30 = vmul.f32 1.442695, %v348_v27  ;;  %v352_v31 = vmul.f32 1.442695, %v349_v28 }
 0x11e   : > { %v787_v32 = vpop.eup %786  ;;  %v524_v33 = vpop.permute.xlu2 %523 }
 0x11f   : > { %v789_v34 = vpop.eup %788  ;;  %792 = vpow2.f32 %v350_v30  ;;  %539 = vmatpush.bf16.msra.mxu3 %v524_v33  ;;  %v514_v36 = vpack.c.bf16 %v787_v32, %v785_v29 }
 0x120   : > { %v791_v35 = vpop.eup %790  ;;  %794 = vpow2.f32 %v352_v31 }
 0x121   : > { %v434_v37 = vpack.c.bf16 %v791_v35, %v789_v34  ;;  %v516_v45 = vunpack.c.h.bf16 %v514_v36  ;;  %v515_v51 = vunpack.c.l.bf16 %v514_v36 }
 0x122   : > { %713 = vmatmul.msk.bf16.vlgmr.msra.gmra.mxu3 %vm252_vm0, %v514_v36 }
 0x123   : > { %710 = vmatmul.msk.bf16.vlgmr.msra.gmra.mxu2 %vm252_vm0, %v434_v37  ;;  %v435_v38 = vunpack.c.l.bf16 %v434_v37  ;;  %v520_v48 = vsel %vm252_vm0, %v516_v45, 0.0  ;;  %v436_v50 = vunpack.c.h.bf16 %v434_v37  ;;  %v517_v53 = vsel %vm252_vm0, %v515_v51, 0.0 }
 0x125   : > { %v793_v39 = vpop.eup %792  ;;  %v437_v40 = vsel %vm252_vm0, %v435_v38, 0.0  ;;  %v440_v52 = vsel %vm252_vm0, %v436_v50, 0.0 }
 0x126   : > { %v795_v41 = vpop.eup %794  ;;  %438 = vadd.xlane.f32.xlu2 %v437_v40 }
 0x127   : > { %v354_v42 = vpack.c.bf16 %v795_v41, %v793_v39 }
 0x129   : > { %v355_v43 = vunpack.c.l.bf16 %v354_v42  ;;  %v356_v44 = vunpack.c.h.bf16 %v354_v42 }
 0x12b   : > { %v357_v46 = vsel %vm252_vm0, %v355_v43, 0.0  ;;  %v360_v47 = vsel %vm252_vm0, %v356_v44, 0.0 }
 0x12c   : > { %358 = vadd.xlane.f32.xlu1 %v357_v46  ;;  %361 = vadd.xlane.f32.xlu0 %v360_v47 }
 0x12e   : > { %521 = vadd.xlane.f32.xlu2 %v520_v48  ;;  %v364_v49 = vpop.permute.xlu1 %363 }
 0x12f   : > { %379 = vmatpush.bf16.msra.mxu1 %v364_v49 }
 0x132   : > { %707 = vmatmul.msk.bf16.vlgmr.msra.gmra.mxu1 %vm252_vm0, %v354_v42 }
 0x134   : > { %441 = vadd.xlane.f32.xlu1 %v440_v52  ;;  %518 = vadd.xlane.f32.xlu0 %v517_v53 }
 0x144   : > { %v255_v54 = vpop.xlane.xlu0 %254 }
 0x145   : > { %v259_v56 = vsub.f32 %v1028_v60, %v255_v54 }
 0x157   : > { %v258_v55 = vpop.xlane.xlu2 %257 }
 0x158   : > { %v260_v57 = vsub.f32 %v1032_v1, %v258_v55 }
 0x15a   : > { %v261_v58 = vpack.c.bf16 %v260_v57, %v259_v56 }
 0x15c   : > { %v262_v59 = vunpack.c.l.bf16 %v261_v58  ;;  %v263_v61 = vunpack.c.h.bf16 %v261_v58 }
 0x15e   : > { %v264_v62 = vmul.f32 1.442695, %v262_v59  ;;  %v266_v63 = vmul.f32 1.442695, %v263_v61 }
 0x160   : > { %796 = vpow2.f32 %v264_v62 }
 0x161   : > { %798 = vpow2.f32 %v266_v63 }
 0x166   : > { %v797_v0 = vpop.eup %796 }
 0x167   : > { %v799_v2 = vpop.eup %798 }
 0x168   : > { %v268_v3 = vpack.c.bf16 %v799_v2, %v797_v0 }
 0x16a   : > { %704 = vmatmul.msk.bf16.vlgmr.msra.gmra.mxu0 %vm252_vm0, %v268_v3  ;;  %v270_v4 = vunpack.c.h.bf16 %v268_v3  ;;  %v269_v5 = vunpack.c.l.bf16 %v268_v3 }
 0x16c   : > { %v274_v6 = vsel %vm252_vm0, %v270_v4, 0.0  ;;  %v271_v60 = vsel %vm252_vm0, %v269_v5, 0.0 }
 0x16d   : > { %275 = vadd.xlane.f32.xlu0 %v274_v6  ;;  %272 = vadd.xlane.f32.xlu1 %v271_v60 }
 0x199   : > { %v439_v1 = vpop.xlane.xlu2 %438 }
 0x19a   : > { %800 = vrcp.f32 %v439_v1 }
 0x19f   : > { %v359_v7 = vpop.xlane.xlu1 %358  ;;  %v362_v8 = vpop.xlane.xlu0 %361 }
 0x1a0   : > { %v801_v9 = vpop.eup %800  ;;  %802 = vrcp.f32 %v359_v7 }
 0x1a1   : > { %v522_v17 = vpop.xlane.xlu2 %521 }
 0x1a5   : > { %v541_v15 = vpop.f32.mrf.mxu3 }
 0x1a6   : > { %v461_v10 = vpop.f32.mrf.mxu2  ;;  %v803_v18 = vpop.eup %802 }
 0x1a7   : > { %v468_v11 = vmul.f32 %v801_v9, %v461_v10  ;;  %v442_v12 = vpop.xlane.xlu1 %441  ;;  %v519_v13 = vpop.xlane.xlu0 %518 }
 0x1a8   : > { %804 = vrcp.f32 %v442_v12 }
 0x1a9   : > { %v472_v14 = vmin.f32 %v468_v11, 0.0  ;;  %806 = vrcp.f32 %v519_v13  ;;  %vm470_vm1 = vcmp.gt.f32.partialorder %v468_v11, 0.0 }
 0x1ab   : > { %v474_v16 = vmul.f32 1.442695, %v472_v14 }
 0x1ad   : > { %808 = vpow2.f32 %v474_v16  ;;  %v543_v30 = vpop.f32.mrf.mxu3 }
 0x1ae   : > { %v805_v19 = vpop.eup %804  ;;  %v463_v20 = vpop.f32.mrf.mxu2  ;;  %810 = vrcp.f32 %v522_v17 }
 0x1af   : > { %v807_v21 = vpop.eup %806  ;;  %v469_v22 = vmul.f32 %v805_v19, %v463_v20  ;;  %v381_v23 = vpop.f32.mrf.mxu1  ;;  %812 = vrcp.f32 %v362_v8 }
 0x1b0   : > { %v388_v26 = vmul.f32 %v803_v18, %v381_v23  ;;  %v548_v24 = vmul.f32 %v807_v21, %v541_v15 }
 0x1b1   : > { %v473_v25 = vmin.f32 %v469_v22, 0.0  ;;  %vm471_vm4 = vcmp.gt.f32.partialorder %v469_v22, 0.0 }
 0x1b2   : > { %v392_v27 = vmin.f32 %v388_v26, 0.0  ;;  %v552_v28 = vmin.f32 %v548_v24, 0.0  ;;  %vm390_vm2 = vcmp.gt.f32.partialorder %v388_v26, 0.0  ;;  %vm550_vm3 = vcmp.gt.f32.partialorder %v548_v24, 0.0 }
 0x1b3   : > { %v809_v29 = vpop.eup %808  ;;  %v476_v35 = vmul.f32 1.442695, %v473_v25 }
 0x1b4   : > { %v394_v31 = vmul.f32 1.442695, %v392_v27  ;;  %v711_v32 = vadd.f32 -1.0, %v809_v29  ;;  %v554_v33 = vmul.f32 1.442695, %v552_v28  ;;  %v811_v34 = vpop.eup %810 }
 0x1b5   : > { %v549_v36 = vmul.f32 %v811_v34, %v543_v30  ;;  %v813_v38 = vpop.eup %812 }
 0x1b6   : > { %814 = vpow2.f32 %v394_v31  ;;  %v480_v37 = vsel %vm470_vm1, %v468_v11, %v711_v32 }
 0x1b7   : > { %572 = vrot.lane.b32.xlu0 %v480_v37, %s903_s28  ;;  %v383_v39 = vpop.f32.mrf.mxu1  ;;  %816 = vpow2.f32 %v554_v33  ;;  %v553_v41 = vmin.f32 %v549_v36, 0.0  ;;  %vm551_vm6 = vcmp.gt.f32.partialorder %v549_v36, 0.0 }
 0x1b8   : > { %v389_v40 = vmul.f32 %v813_v38, %v383_v39  ;;  %818 = vpow2.f32 %v476_v35 }
 0x1b9   : > { %v556_v47 = vmul.f32 1.442695, %v553_v41 }
 0x1ba   : > { %v393_v42 = vmin.f32 %v389_v40, 0.0  ;;  %vm391_vm5 = vcmp.gt.f32.partialorder %v389_v40, 0.0 }
 0x1bc   : > { %v815_v43 = vpop.eup %814  ;;  %v396_v44 = vmul.f32 1.442695, %v393_v42 }
 0x1bd   : > { %v817_v45 = vpop.eup %816  ;;  %v708_v46 = vadd.f32 -1.0, %v815_v43 }
 0x1be   : > { %820 = vpow2.f32 %v396_v44  ;;  %v714_v48 = vadd.f32 -1.0, %v817_v45  ;;  %v819_v50 = vpop.eup %818 }
 0x1bf   : > { %v400_v49 = vsel %vm390_vm2, %v388_v26, %v708_v46  ;;  %822 = vpow2.f32 %v556_v47  ;;  %v712_v52 = vadd.f32 -1.0, %v819_v50 }
 0x1c0   : > { %v560_v51 = vsel %vm550_vm3, %v548_v24, %v714_v48  ;;  %564 = vrot.lane.b32.xlu2 %v400_v49, %s904_s29 }
 0x1c1   : > { %580 = vrot.lane.b32.xlu0 %v560_v51, %s905_s30  ;;  %v481_v55 = vsel %vm471_vm4, %v469_v22, %v712_v52 }
 0x1c4   : > { %v821_v53 = vpop.eup %820 }
 0x1c5   : > { %v709_v54 = vadd.f32 -1.0, %v821_v53  ;;  %v823_v57 = vpop.eup %822 }
 0x1c6   : > { %v715_v58 = vadd.f32 -1.0, %v823_v57 }
 0x1c7   : > { %v401_v56 = vsel %vm391_vm5, %v389_v40, %v709_v54 }
 0x1c8   : > { %574 = vrot.lane.b32.xlu2 %v481_v55, %s903_s28  ;;  %566 = vrot.lane.b32.xlu1 %v401_v56, %s904_s29  ;;  %v561_v59 = vsel %vm551_vm6, %v549_v36, %v715_v58 }
 0x1d0   : > { %582 = vrot.lane.b32.xlu1 %v561_v59, %s905_s30 }
 0x1e0   : > { %v273_v61 = vpop.xlane.xlu1 %272  ;;  %v276_v2 = vpop.xlane.xlu0 %275 }
 0x1e1   : > { %824 = vrcp.f32 %v273_v61 }
 0x1e2   : > { %826 = vrcp.f32 %v276_v2 }
 0x1e7   : > { %v825_v62 = vpop.eup %824  ;;  %v301_v63 = vpop.f32.mrf.mxu0 }
 0x1e8   : > { %v308_v0 = vmul.f32 %v825_v62, %v301_v63  ;;  %v827_v6 = vpop.eup %826 }
 0x1ea   : > { %v312_v3 = vmin.f32 %v308_v0, 0.0  ;;  %vm310_vm8 = vcmp.gt.f32.partialorder %v308_v0, 0.0 }
 0x1ec   : > { %v314_v4 = vmul.f32 1.442695, %v312_v3 }
 0x1ee   : > { %828 = vpow2.f32 %v314_v4 }
 0x1ef   : > { %v303_v5 = vpop.f32.mrf.mxu0 }
 0x1f0   : > { %v309_v60 = vmul.f32 %v827_v6, %v303_v5 }
 0x1f2   : > { %v313_v1 = vmin.f32 %v309_v60, 0.0  ;;  %vm311_vm11 = vcmp.gt.f32.partialorder %v309_v60, 0.0 }
 0x1f4   : > { %v829_v7 = vpop.eup %828  ;;  %v316_v10 = vmul.f32 1.442695, %v313_v1 }
 0x1f5   : > { %v705_v9 = vadd.f32 -1.0, %v829_v7 }
 0x1f6   : > { %830 = vpow2.f32 %v316_v10 }
 0x1f7   : > { %v320_v12 = vsel %vm310_vm8, %v308_v0, %v705_v9 }
 0x1fc   : > { %v831_v17 = vpop.eup %830 }
 0x1fd   : > { %v706_v18 = vadd.f32 -1.0, %v831_v17 }
 0x1ff   : > { %v321_v20 = vsel %vm311_vm11, %v309_v60, %v706_v18 }
 0x21a   : > { %v565_v11 = vpop.permute.xlu2 %564 }
 0x21b   : > { %v587_v13 = vsel %vm586_vm7, %v320_v12, %v565_v11 }
 0x222   : > { %v575_v22 = vpop.permute.xlu2 %574 }
 0x229   : > { %v573_v8 = vpop.permute.xlu0 %572 }
 0x22a   : > { %v590_v14 = vsel %vm589_vm9, %v587_v13, %v573_v8 }
 0x233   : > { %v581_v15 = vpop.permute.xlu0 %580 }
 0x234   : > { %v593_v16 = vsel %vm592_vm10, %v590_v14, %v581_v15 }
 0x235   : > { %595 = vst.msk [vmem:[%s207_s7] sm:$0xff] %vm252_vm0, %v593_v16 }
 0x23a   : > { %v567_v19 = vpop.permute.xlu1 %566 }
 0x23b   : > { %v588_v21 = vsel %vm586_vm7, %v321_v20, %v567_v19 }
 0x23c   : > { %v591_v26 = vsel %vm589_vm9, %v588_v21, %v575_v22 }
 0x242   : > { %v583_v23 = vpop.permute.xlu1 %582 }
 0x243   : > { %v594_v24 = vsel %vm592_vm10, %v591_v26, %v583_v23 }
 0x244   : > { %596 = vst.msk [vmem:[%s207_s7 + $0x8] sm:$0xff] %vm252_vm0, %v594_v24 }
 0x245   : > { %859 = shalt.err (!%p856_p3)
}
 0x246   : > { %s906_s5 = smov 128  }
 0x247   : > { %728 = dma.vmem_to_hbm [thread:$0]  (%p970_p5), %s611_s12, 256, %s613_s13, %s598_s19, %s906_s5, %s906_s5, %s904_s29  }
 0x248 PF: > { %p734_p4 = scmp.ge.s32.totalorder %s894_s18, 2  ;;  %s627_s6 = sand.u32 1, %s882_s15  }
 0x249   : > { %s628_s7 = scalar_lea.sflag [#allocation3], %s627_s6 }
 0x24a   : > { %p731_p7 = pnand %p734_p4, %p974_p6 }
 0x24c   : > { %p732_p8 = pneg %p731_p7 }
 0x24e   : > { %877 = dma.done.wait (%p732_p8), %s628_s7, 256  }
 0x24f   : > { %879 = vsyncadd (%p732_p8), %s628_s7, 4294967040  ;;  %p14_p9 = scmp.ge.s32.totalorder %s957_s21, 4   ;;  %s1108_s15 = smov %s886_s16 }
 0x250   : > { %s1109_s16 = smov %s890_s17  ;;  %s1110_s17 = smov %s968_s24 }
 0x251   : > { %s1111_s18 = smov %s957_s21  ;;  %16 = sbr.rel (!%p14_p9) target bundleno = 3 (0x3), region = 74 }
 0x256   :  { %634 = vsyncpa [#allocation3], 1 }
 0x257   :  { %636 = vsyncpa [#allocation3 + $0x1], 1 }

</bundles_post_ra>
